<compile_context>
chip_gen: v5e
topology: v5e:2x2
jax: 0.10.0
libtpu: 0.0.40
codegen_flags: <defaults>
</compile_context>

<pallas_src>
import math
from functools import partial

import jax
import jax.numpy as jnp
from jax.experimental import pallas as pl
from jax.experimental.pallas import tpu as pltpu


# ---------------------------------------------------------------------------
# Kernels
# ---------------------------------------------------------------------------
def _make_scores_kernel(has_mask):
    """Pass 1: attention scores a[b,s] for one batch tile (rows are independent)."""

    def kernel(*refs):
        if has_mask:
            x_ref, w_ref, m_ref, a_ref = refs
        else:
            x_ref, w_ref, a_ref = refs

        x = x_ref[...].astype(jnp.float32)           # (tb, S, F)
        w = w_ref[...]                               # (1, 1, F), f32

        # Per-(b,s) dot over the feature dim: VPU multiply + XLU cross-lane sum.
        eij = jnp.sum(x * w, axis=-1)                # (tb, S)
        e = jnp.exp(jnp.tanh(eij))                   # EUP

        if has_mask:
            e = e * m_ref[...]                       # (tb, S)

        denom = jnp.sum(e, axis=-1, keepdims=True)   # (tb, 1)
        # approx=False keeps exact 1/x (matches the torch divide to ~1 ulp);
        # the (tb,1) array is tiny so the EUP-approx saving would be noise here.
        a = e * pl.reciprocal(denom, approx=False) + 1e-10
        a_ref[...] = a.astype(a_ref.dtype)

    return kernel


def _make_weighted_kernel(S, F):
    """Pass 2: weighted_input on the lane-dense flattened (tb, S*F) layout."""

    def kernel(x_ref, at_ref, wi_ref):
        tb = x_ref.shape[0]
        x = x_ref[...]                               # (tb, S*F), lane-dense
        at = at_ref[...]                             # (tb, S), at[i, j] = a[j, i]

        # Expand a^T to the flattened layout: m[i, j*F + f] = at[i, j].
        # (VMEM-local relayout; the HBM-facing load and store stay lane-dense.)
        m = jnp.broadcast_to(at[:, :, None], (tb, S, F)).reshape(tb, S * F)

        wi_ref[...] = (x.astype(jnp.float32) * m).astype(wi_ref.dtype)

    return kernel


# ---------------------------------------------------------------------------
# Wrapper
# ---------------------------------------------------------------------------
def _pick_batch_tile(B, row_bytes, vmem_budget=8 * 1024 * 1024):
    """Largest sublane-aligned divisor of B whose double-buffered (in + out)
    tiles stay under a conservative VMEM budget (v7x-safe: 64 MiB physical,
    ~32 MiB scoped default — stay far below)."""
    divisors = [d for d in range(B, 0, -1)
                if B % d == 0 and (d % 8 == 0 or d == B)]
    for d in divisors:
        if 4 * d * row_bytes <= vmem_budget:   # ~2 buffers x (x tile + wi tile)
            return d
    return divisors[-1]


@partial(jax.jit, static_argnames=("step_dim",))
def attention_forward(x, weight, step_dim, mask=None):
    """Replicates Attention.forward. Returns (weighted_input, a[..., None])."""
    B, S, F = x.shape
    assert S == step_dim
    assert weight.shape == (F, 1)
    assert B == S, "torch broadcast in this module requires batch == step_dim"

    tile_b = _pick_batch_tile(B, S * F * max(jnp.dtype(x.dtype).itemsize, 4))
    grid = (B // tile_b,)
    parallel = pltpu.CompilerParams(dimension_semantics=("parallel",))

    w_row = weight.reshape(1, 1, F).astype(jnp.float32)

    # ---- pass 1: attention scores a (B, S) ------------------------------
    in_specs = [
        pl.BlockSpec((tile_b, S, F), lambda i: (i, 0, 0)),
        pl.BlockSpec((1, 1, F), lambda i: (0, 0, 0)),
    ]
    args = [x, w_row]
    if mask is not None:
        in_specs.append(pl.BlockSpec((tile_b, S), lambda i: (i, 0)))
        args.append(mask.astype(jnp.float32))

    a = pl.pallas_call(
        _make_scores_kernel(mask is not None),
        out_shape=jax.ShapeDtypeStruct((B, S), jnp.float32),
        grid=grid,
        in_specs=in_specs,
        out_specs=pl.BlockSpec((tile_b, S), lambda i: (i, 0)),
        compiler_params=parallel,
    )(*args)

    # Tiny (B,S) transpose done once, outside the tiled loop.
    a_t = jnp.swapaxes(a, 0, 1)                      # a_t[i, j] = a[j, i]

    # ---- pass 2: weighted_input, lane-dense flattened layout -------------
    x_flat = x.reshape(B, S * F)                     # free row-major reshape
    wi_flat = pl.pallas_call(
        _make_weighted_kernel(S, F),
        out_shape=jax.ShapeDtypeStruct((B, S * F), x.dtype),
        grid=grid,
        in_specs=[
            pl.BlockSpec((tile_b, S * F), lambda i: (i, 0)),
            pl.BlockSpec((tile_b, S), lambda i: (i, 0)),
        ],
        out_specs=pl.BlockSpec((tile_b, S * F), lambda i: (i, 0)),
        compiler_params=parallel,
    )(x_flat, a_t)

    wi = wi_flat.reshape(B, S, F)
    return wi, a[:, :, None]


# ---------------------------------------------------------------------------
# Reference (pure JAX mirror of the torch module) + test harness
# ---------------------------------------------------------------------------
def _reference_forward(x, weight, step_dim, mask=None):
    F = weight.shape[0]
    eij = (x.reshape(-1, F) @ weight).reshape(-1, step_dim)
    eij = jnp.tanh(eij)
    a = jnp.exp(eij)
    if mask is not None:
        a = a * mask
    a = a / jnp.sum(a, axis=1, keepdims=True) + 1e-10
    wi = x * jnp.swapaxes(a[:, :, None], 0, 1)
    return wi, a[:, :, None]


def xavier_uniform(key, shape):
    fan_in, fan_out = shape[0], shape[1]
    bound = math.sqrt(6.0 / (fan_in + fan_out))
    return jax.random.uniform(key, shape, jnp.float32, -bound, bound)


if __name__ == "__main__":
    B = 8          # batch (must equal step_dim for the torch broadcast)
    S = 8          # step_dim
    F = 32         # feature_dim

    key = jax.random.PRNGKey(0)
    kx, kw, km = jax.random.split(key, 3)

    x = jax.random.normal(kx, (B, S, F), dtype=jnp.float32)
    weight = xavier_uniform(kw, (F, 1))   # nn.init.xavier_uniform_ equivalent

    # mask=None path (specialized kernel, no mask DMA)
    wi, a = attention_forward(x, weight, step_dim=S, mask=None)
    jax.block_until_ready((wi, a))
    wi_ref, a_ref = _reference_forward(x, weight, S, None)
    assert wi.shape == (B, S, F) and a.shape == (B, S, 1)
    assert jnp.allclose(wi, wi_ref, atol=1e-5, rtol=1e-5)
    assert jnp.allclose(a, a_ref, atol=1e-5, rtol=1e-5)

    # masked path (keep at least one valid position per row to avoid 0 row-sums,
    # matching the reference's own failure mode otherwise)
    mask = (jax.random.uniform(km, (B, S)) > 0.4).astype(jnp.float32)
    mask = mask.at[:, 0].set(1.0)
    wi_m, a_m = attention_forward(x, weight, step_dim=S, mask=mask)
    jax.block_until_ready((wi_m, a_m))
    wi_mr, a_mr = _reference_forward(x, weight, S, mask)
    assert jnp.allclose(wi_m, wi_mr, atol=1e-5, rtol=1e-5)
    assert jnp.allclose(a_m, a_mr, atol=1e-5, rtol=1e-5)

    print("KERNEL_OK")
</pallas_src>

<mosaic_0001>
module attributes {stable_mosaic.version = 11 : i64} {
  func.func @kernel(%arg0: i32, %arg1: memref<8x256xf32, #tpu.memory_space<vmem>>, %arg2: memref<8x8xf32, #tpu.memory_space<vmem>>, %arg3: memref<8x256xf32, #tpu.memory_space<vmem>>) attributes {dimension_semantics = [#tpu.dimension_semantics<parallel>], iteration_bounds = array<i64: 1>, scalar_prefetch = 0 : i64, scratch_operands = 0 : i64, tpu.core_type = #tpu.core_type<tc>, window_params = [{transform_indices = @transform_0, window_bounds = array<i64: 8, 256>}, {transform_indices = @transform_1, window_bounds = array<i64: 8, 8>}, {transform_indices = @transform_2, window_bounds = array<i64: 8, 256>}]} {
    %c0 = arith.constant 0 : index
    %c0_0 = arith.constant 0 : index
    %0 = vector.load %arg1[%c0, %c0_0] : memref<8x256xf32, #tpu.memory_space<vmem>>, vector<8x256xf32>
    %c0_1 = arith.constant 0 : index
    %c0_2 = arith.constant 0 : index
    %1 = vector.load %arg2[%c0_1, %c0_2] : memref<8x8xf32, #tpu.memory_space<vmem>>, vector<8x8xf32>
    %2 = vector.shape_cast %1 : vector<8x8xf32> to vector<8x8x1xf32>
    %3 = vector.shape_cast %2 : vector<8x8x1xf32> to vector<8x8x1xf32>
    %4 = vector.broadcast %3 : vector<8x8x1xf32> to vector<8x8x32xf32>
    %5 = vector.shape_cast %4 : vector<8x8x32xf32> to vector<8x256xf32>
    %6 = arith.mulf %0, %5 : vector<8x256xf32>
    %c0_3 = arith.constant 0 : index
    %c0_4 = arith.constant 0 : index
    %7 = vector.load %arg3[%c0_3, %c0_4] : memref<8x256xf32, #tpu.memory_space<vmem>>, vector<8x256xf32>
    tpu.vector_store %arg3[%c0_3, %c0_4], %6 {strides = array<i32>} : memref<8x256xf32, #tpu.memory_space<vmem>>, vector<8x256xf32>,
    return
  }
  func.func @transform_0(%arg0: i32) -> (i32, i32) {
    %c0_i32 = arith.constant 0 : i32
    %c0_i32_0 = arith.constant 0 : i32
    return %arg0, %c0_i32 : i32, i32
  }
  func.func @transform_1(%arg0: i32) -> (i32, i32) {
    %c0_i32 = arith.constant 0 : i32
    %c0_i32_0 = arith.constant 0 : i32
    return %arg0, %c0_i32 : i32, i32
  }
  func.func @transform_2(%arg0: i32) -> (i32, i32) {
    %c0_i32 = arith.constant 0 : i32
    %c0_i32_0 = arith.constant 0 : i32
    return %arg0, %c0_i32 : i32, i32
  }
}

module attributes {stable_mosaic.version = 11 : i64} {
  func.func @kernel(%arg0: i32, %arg1: memref<8x8x32xf32, #tpu.memory_space<vmem>>, %arg2: memref<1x1x32xf32, #tpu.memory_space<vmem>>, %arg3: memref<8x8xf32, #tpu.memory_space<vmem>>) attributes {dimension_semantics = [#tpu.dimension_semantics<parallel>], iteration_bounds = array<i64: 1>, scalar_prefetch = 0 : i64, scratch_operands = 0 : i64, tpu.core_type = #tpu.core_type<tc>, window_params = [{transform_indices = @transform_0, window_bounds = array<i64: 8, 8, 32>}, {pipeline_mode = #tpu.pipeline_mode<synchronous>, transform_indices = @transform_1, window_bounds = array<i64: 1, 1, 32>}, {transform_indices = @transform_2, window_bounds = array<i64: 8, 8>}]} {
    %c0 = arith.constant 0 : index
    %c0_0 = arith.constant 0 : index
    %c0_1 = arith.constant 0 : index
    %0 = vector.load %arg1[%c0, %c0_0, %c0_1] : memref<8x8x32xf32, #tpu.memory_space<vmem>>, vector<8x8x32xf32>
    %c0_2 = arith.constant 0 : index
    %c0_3 = arith.constant 0 : index
    %c0_4 = arith.constant 0 : index
    %1 = vector.load %arg2[%c0_2, %c0_3, %c0_4] : memref<1x1x32xf32, #tpu.memory_space<vmem>>, vector<1x1x32xf32>
    %2 = vector.broadcast %1 : vector<1x1x32xf32> to vector<8x8x32xf32>
    %3 = arith.mulf %0, %2 : vector<8x8x32xf32>
    %cst = arith.constant dense<0.000000e+00> : vector<8x8xf32>
    %4 = vector.multi_reduction <add>, %3, %cst [2] : vector<8x8x32xf32> to vector<8x8xf32>
    %5 = math.tanh %4 : vector<8x8xf32>
    %6 = math.exp %5 : vector<8x8xf32>
    %cst_5 = arith.constant dense<0.000000e+00> : vector<8xf32>
    %7 = vector.multi_reduction <add>, %6, %cst_5 [1] : vector<8x8xf32> to vector<8xf32>
    %8 = vector.shape_cast %7 : vector<8xf32> to vector<8x1xf32>
    %9 = tpu.reciprocal %8 : vector<8x1xf32> -> vector<8x1xf32>
    %10 = vector.broadcast %9 : vector<8x1xf32> to vector<8x8xf32>
    %11 = arith.mulf %6, %10 : vector<8x8xf32>
    %cst_6 = arith.constant 1.000000e-10 : f32
    %12 = vector.broadcast %cst_6 : f32 to vector<8x8xf32>
    %13 = arith.addf %11, %12 : vector<8x8xf32>
    %c0_7 = arith.constant 0 : index
    %c0_8 = arith.constant 0 : index
    %14 = vector.load %arg3[%c0_7, %c0_8] : memref<8x8xf32, #tpu.memory_space<vmem>>, vector<8x8xf32>
    tpu.vector_store %arg3[%c0_7, %c0_8], %13 {strides = array<i32>} : memref<8x8xf32, #tpu.memory_space<vmem>>, vector<8x8xf32>,
    return
  }
  func.func @transform_0(%arg0: i32) -> (i32, i32, i32) {
    %c0_i32 = arith.constant 0 : i32
    %c0_i32_0 = arith.constant 0 : i32
    %c0_i32_1 = arith.constant 0 : i32
    return %arg0, %c0_i32, %c0_i32_0 : i32, i32, i32
  }
  func.func @transform_1(%arg0: i32) -> (i32, i32, i32) {
    %c0_i32 = arith.constant 0 : i32
    %c0_i32_0 = arith.constant 0 : i32
    %c0_i32_1 = arith.constant 0 : i32
    %c0_i32_2 = arith.constant 0 : i32
    return %c0_i32, %c0_i32_0, %c0_i32_1 : i32, i32, i32
  }
  func.func @transform_2(%arg0: i32) -> (i32, i32) {
    %c0_i32 = arith.constant 0 : i32
    %c0_i32_0 = arith.constant 0 : i32
    return %arg0, %c0_i32 : i32, i32
  }
}

</mosaic_0001>

<bundles_post_ra>
// kernel: attention_forward.3
= control target key start
LH: loop header
LB: loop body
LE: loop exit
PB: predicated region body
PF: predicated region fallthrough
CT: control target
= control target key end

     0   :  { %v15_v0 = vlaneseq  ;;  %v232_v15 = vmov 1983009808   ;;  %vm71_vm0 = vcmask 1047556   ;;  %v233_v35 = vmov 1934713408   ;;  %s235_s11 = smov 64   ;;  %s291_s1 = inlined_call_operand.vmem [shape: f32[8,8], index: 1, kind: input, shape index: {}]   ;;  %s292_s0 = inlined_call_operand.vmem [shape: f32[8,256], index: 0, kind: input, shape index: {}]   ;;  %s293_s2 = inlined_call_operand.vmem [shape: f32[8,256], index: 2, kind: output, shape index: {}]  }
   0x1   :  { %v13_v2 = vld [vmem:[%s291_s1] sm:$0xff]  ;;  %v76_v16 = vunpack.c.l.s4 %v232_v15  ;;  %v124_v36 = vunpack.c.l.s4 %v233_v35  ;;  %s234_s1 = smov 32   ;;  %s236_s12 = smov 96   ;;  %vm207_vm1 = vcmask 261120   ;;  %vm209_vm2 = vcmask 523264  }
   0x2   :  { %v16_v1 = vshrl.u32 %v15_v0, 7  ;;  %v42_v3 = vperm.slane %v13_v2, 4  ;;  %v21_v4 = vperm.slane %v13_v2, 1  ;;  %v14_v5 = vperm.slane %v13_v2, 0 }
   0x3   :  { %v56_v6 = vperm.slane %v13_v2, 6  ;;  %v35_v7 = vperm.slane %v13_v2, 3  ;;  %v28_v8 = vperm.slane %v13_v2, 2  ;;  %v63_v9 = vperm.slane %v13_v2, 7 }
   0x4   :  { %230 = vset.pattern.permute.xlu1 %v16_v1  ;;  %229 = vset.pattern.permute.xlu0 %v16_v1  ;;  %v49_v10 = vperm.slane %v13_v2, 5  ;;  %v77_v20 = vunpack.c.0.s8 %v76_v16  ;;  %v125_v47 = vunpack.c.0.s8 %v124_v36  ;;  %vm211_vm3 = vcmask 785408  }
   0x5   :  { %231 = vset.pattern.permute.xlu2 %v16_v1 }
   0xc   :  { %47 = vperm.xlu1 %230, %v42_v3   ;;  %26 = vperm.xlu0 %229, %v21_v4  }
   0xd   :  { %19 = vperm.xlu2 %231, %v14_v5  }
  0x14   :  { %61 = vperm.xlu1 %230, %v56_v6   ;;  %40 = vperm.xlu0 %229, %v35_v7  }
  0x15   :  { %33 = vperm.xlu2 %231, %v28_v8  }
  0x1c   :  { %68 = vperm.xlu1 %230, %v63_v9   ;;  %54 = vperm.xlu0 %229, %v49_v10  }
  0x67   :  { %v20_v11 = vpop.permute.xlu2 %19 }
  0x68   :  { %v73_v19 = vrot.slane %v20_v11, 4 }
  0x6f   :  { %v34_v14 = vpop.permute.xlu2 %33 }
  0x70   :  { %v70_v17 = vrot.slane %v34_v14, 4  ;;  %v74_v29 = vsel %vm71_vm0, %v34_v14, %v73_v19 }
  0x71   :  { %v82_v37 = vperm.slane %v74_v29, %v77_v20 }
  0x72   :  { %v72_v26 = vsel %vm71_vm0, %v70_v17, %v20_v11 }
  0x73   :  { %v78_v31 = vperm.slane %v72_v26, %v77_v20  ;;  %v133_v56 = vrot.slane %v82_v37, 4 }
  0x75   :  { %v121_v43 = vrot.slane %v78_v31, 4 }
  0x7e   :  { %v48_v12 = vpop.permute.xlu1 %47  ;;  %v27_v13 = vpop.permute.xlu0 %26 }
  0x7f   :  { %v85_v18 = vrot.slane %v27_v13, 4  ;;  %v97_v34 = vrot.slane %v48_v12, 4 }
  0x86   :  { %v62_v21 = vpop.permute.xlu1 %61  ;;  %v41_v22 = vpop.permute.xlu0 %40 }
  0x87   :  { %v95_v23 = vrot.slane %v62_v21, 4  ;;  %v83_v24 = vrot.slane %v41_v22, 4  ;;  %v86_v25 = vsel %vm71_vm0, %v41_v22, %v85_v18  ;;  %v98_v39 = vsel %vm71_vm0, %v62_v21, %v97_v34 }
  0x88   :  { %v94_v27 = vperm.slane %v86_v25, %v77_v20  ;;  %v106_v48 = vperm.slane %v98_v39, %v77_v20 }
  0x89   :  { %v84_v28 = vsel %vm71_vm0, %v83_v24, %v27_v13  ;;  %v96_v32 = vsel %vm71_vm0, %v95_v23, %v48_v12 }
  0x8a   :  { %v90_v30 = vperm.slane %v84_v28, %v77_v20  ;;  %v131_v33 = vrot.slane %v94_v27, 4  ;;  %v102_v40 = vperm.slane %v96_v32, %v77_v20  ;;  %v157_v62 = vrot.slane %v106_v48, 4  ;;  %v12_v32 = vld [vmem:[%s292_s0 + $0x8] sm:$0xff] }
  0x8b   :  { %v134_v8 = vsel %vm71_vm0, %v94_v27, %v133_v56 }
  0x8c   :  { %v119_v38 = vrot.slane %v90_v30, 4  ;;  %v132_v46 = vsel %vm71_vm0, %v131_v33, %v82_v37  ;;  %v145_v52 = vrot.slane %v102_v40, 4  ;;  %v122_v57 = vsel %vm71_vm0, %v90_v30, %v121_v43 }
  0x8d   :  { %v138_v55 = vperm.slane %v132_v46, %v125_v47  ;;  %v130_v2 = vperm.slane %v122_v57, %v125_v47  ;;  %v142_v16 = vperm.slane %v134_v8, %v125_v47 }
  0x8e   :  { %v69_v41 = vpop.permute.xlu1 %68  ;;  %v55_v42 = vpop.permute.xlu0 %54  ;;  %v120_v51 = vsel %vm71_vm0, %v119_v38, %v78_v31  ;;  %v11_v31 = vld [vmem:[%s292_s0] sm:$0xff] }
  0x8f   :  { %v107_v44 = vrot.slane %v69_v41, 4  ;;  %v109_v45 = vrot.slane %v55_v42, 4  ;;  %v126_v61 = vperm.slane %v120_v51, %v125_v47  ;;  %v177_v1 = vrot.slane %v138_v55, 4 }
  0x90   :  { %v181_v21 = vrot.slane %v142_v16, 4 }
  0x91   :  { %v108_v49 = vsel %vm71_vm0, %v107_v44, %v55_v42  ;;  %v110_v50 = vsel %vm71_vm0, %v69_v41, %v109_v45  ;;  %v169_v9 = vrot.slane %v126_v61, 4 }
  0x92   :  { %v114_v53 = vperm.slane %v108_v49, %v77_v20  ;;  %v118_v54 = vperm.slane %v110_v50, %v77_v20  ;;  %v173_v20 = vrot.slane %v130_v2, 4 }
  0x94   :  { %v143_v58 = vrot.slane %v114_v53, 4  ;;  %v146_v59 = vsel %vm71_vm0, %v114_v53, %v145_v52  ;;  %v155_v60 = vrot.slane %v118_v54, 4  ;;  %v158_v7 = vsel %vm71_vm0, %v118_v54, %v157_v62 }
  0x95   :  { %v154_v63 = vperm.slane %v146_v59, %v125_v47  ;;  %v166_v15 = vperm.slane %v158_v7, %v125_v47 }
  0x96   :  { %v156_v0 = vsel %vm71_vm0, %v155_v60, %v106_v48  ;;  %v144_v3 = vsel %vm71_vm0, %v143_v58, %v102_v40 }
  0x97   :  { %v162_v4 = vperm.slane %v156_v0, %v125_v47  ;;  %v171_v5 = vrot.slane %v154_v63, 4  ;;  %v150_v6 = vperm.slane %v144_v3, %v125_v47  ;;  %v179_v19 = vrot.slane %v166_v15, 4 }
  0x98   :  { %v174_v22 = vsel %vm71_vm0, %v154_v63, %v173_v20  ;;  %v182_v23 = vsel %vm71_vm0, %v166_v15, %v181_v21 }
  0x99   :  { %v175_v10 = vrot.slane %v162_v4, 4  ;;  %v178_v11 = vsel %vm71_vm0, %v162_v4, %v177_v1  ;;  %v172_v12 = vsel %vm71_vm0, %v171_v5, %v130_v2  ;;  %v167_v13 = vrot.slane %v150_v6, 4 }
  0x9a   :  { %196 = vrot.lane.b32.xlu0 %v178_v11, %s234_s1  ;;  %188 = vrot.lane.b32.xlu1 %v172_v12, %s235_s11  ;;  %v170_v14 = vsel %vm71_vm0, %v150_v6, %v169_v9  ;;  %v180_v24 = vsel %vm71_vm0, %v179_v19, %v142_v16 }
  0x9b   :  { %184 = vrot.lane.b32.xlu2 %v170_v14, %s234_s1  ;;  %v168_v17 = vsel %vm71_vm0, %v167_v13, %v126_v61  ;;  %v176_v18 = vsel %vm71_vm0, %v175_v10, %v138_v55 }
  0xa2   :  { %192 = vrot.lane.b32.xlu0 %v174_v22, %s236_s12  ;;  %204 = vrot.lane.b32.xlu1 %v182_v23, %s236_s12 }
  0xa3   :  { %200 = vrot.lane.b32.xlu2 %v180_v24, %s235_s11 }
  0xf5   :  { %v185_v25 = vpop.permute.xlu2 %184 }
  0xf6   :  { %v208_v29 = vsel %vm207_vm1, %v168_v17, %v185_v25 }
  0xfd   :  { %v201_v30 = vpop.permute.xlu2 %200 }
 0x10c   :  { %v197_v26 = vpop.permute.xlu0 %196  ;;  %v189_v27 = vpop.permute.xlu1 %188 }
 0x10d   :  { %v213_v28 = vsel %vm207_vm1, %v176_v18, %v197_v26  ;;  %v210_v33 = vsel %vm209_vm2, %v208_v29, %v189_v27 }
 0x10e   :  { %v214_v36 = vsel %vm209_vm2, %v213_v28, %v201_v30 }
 0x114   :  { %v193_v34 = vpop.permute.xlu0 %192  ;;  %v205_v35 = vpop.permute.xlu1 %204 }
 0x115   :  { %v212_v37 = vsel %vm211_vm3, %v210_v33, %v193_v34  ;;  %v215_v38 = vsel %vm211_vm3, %v214_v36, %v205_v35 }
 0x116   :  { %v216_v39 = vmul.f32 %v212_v37, %v11_v31  ;;  %v217_v40 = vmul.f32 %v215_v38, %v12_v32 }
 0x118   :  { %218 = vst [vmem:[%s293_s2] sm:$0xff] %v216_v39 }
 0x119   :  { %219 = vst [vmem:[%s293_s2 + $0x8] sm:$0xff] %v217_v40 }

// kernel: attention_forward.2
= control target key start
LH: loop header
LB: loop body
LE: loop exit
PB: predicated region body
PF: predicated region fallthrough
CT: control target
= control target key end

     0   :  { %7 = vsyncpa [#allocation3], 0  ;;  %s427_s0 = inlined_call_operand.hbm [shape: f32[8,8,32], index: 0, kind: input, shape index: {}]   ;;  %s428_s1 = inlined_call_operand.hbm [shape: f32[1,1,32], index: 1, kind: input, shape index: {}]   ;;  %s429_s2 = inlined_call_operand.vmem [shape: f32[8,8], index: 2, kind: output, shape index: {}]  }
   0x1   :  { %s13_s11 = sshll.u32 %s427_s0, 4  ;;  %s14_s11 = int_to_ptr.hbm [resolvable:$true] %s13_s11 }
   0x2   :  { %8 = vsyncpa [#allocation5], 0  ;;  %s344_s12 = smov [#allocation2]   ;;  %s27_s16 = sshll.u32 %s428_s1, 4  ;;  %s28_s16 = int_to_ptr.hbm [resolvable:$true] %s27_s16 }
   0x3   :  { %s15_s13 = sshll.u32 %s344_s12, 4  ;;  %s345_s17 = smov 128   ;;  %s16_s13 = int_to_ptr.vmem [resolvable:$true] %s15_s13 }
   0x4   :  { %s346_s18 = smov 8   ;;  %s347_s19 = smov [#allocation4]  }
   0x5   :  { %21 = dma.hbm_to_vmem [thread:$0]  %s14_s11, 1024, %s16_s13, [#allocation3], %s345_s17, %s345_s17, %s346_s18  }
   0x6   :  { %s29_s20 = sshll.u32 %s347_s19, 4  ;;  %s30_s20 = int_to_ptr.vmem [resolvable:$true] %s29_s20 }
   0x7   :  { %32 = dma.hbm_to_vmem [thread:$0]  %s28_s16, 16, %s30_s20, [#allocation5]  }
   0x8   :  { %340 = dma.done.wait [#allocation3], 1024  }
   0x9   :  { %341 = vsyncadd [#allocation3], 4294966272 }
   0xa   :  { %342 = dma.done.wait [#allocation5], 16  }
   0xb   :  { %343 = vsyncadd [#allocation5], 4294967280  ;;  %v41_v0 = vld [vmem:[#allocation2] sm:$0xff]  ;;  %vm61_vm0 = vcmask 261120   ;;  %v43_v2 = vld [vmem:[#allocation2 + $0x10] sm:$0xff]  ;;  %v118_v40 = vlaneseq  ;;  %vm128_vm1 = vcmask 1041409  }
   0xc   :  { %v257_v1 = vld [vmem:[#allocation4] ss:$0 sm:$0xff]  ;;  %v42_v7 = vld [vmem:[#allocation2 + $0x8] sm:$0xff]  ;;  %v44_v8 = vld [vmem:[#allocation2 + $0x18] sm:$0xff]  ;;  %vm130_vm2 = vcmask 1042434   ;;  %vm132_vm3 = vcmask 1043459  }
   0xd   :  { %v45_v3 = vld [vmem:[#allocation2 + $0x20] sm:$0xff]  ;;  %v53_v4 = vmul.f32 %v257_v1, %v41_v0  ;;  %v55_v5 = vmul.f32 %v257_v1, %v43_v2  ;;  %v46_v12 = vld [vmem:[#allocation2 + $0x28] sm:$0xff]  ;;  %v54_v13 = vmul.f32 %v257_v1, %v42_v7  ;;  %v56_v14 = vmul.f32 %v257_v1, %v44_v8  ;;  %v47_v19 = vld [vmem:[#allocation2 + $0x30] sm:$0xff] }
   0xe   :  { %v57_v6 = vmul.f32 %v257_v1, %v45_v3  ;;  %v58_v15 = vmul.f32 %v257_v1, %v46_v12  ;;  %v48_v20 = vld [vmem:[#allocation2 + $0x38] sm:$0xff]  ;;  %v59_v21 = vmul.f32 %v257_v1, %v47_v19  ;;  %v380_v46 = vand.u32 127, %v118_v40 }
   0xf   :  { %v62_v9 = vsel %vm61_vm0, %v53_v4, 0.0  ;;  %v68_v10 = vsel %vm61_vm0, %v55_v5, 0.0  ;;  %v65_v16 = vsel %vm61_vm0, %v54_v13, 0.0  ;;  %v71_v17 = vsel %vm61_vm0, %v56_v14, 0.0 }
  0x10   :  { %v74_v11 = vsel %vm61_vm0, %v57_v6, 0.0  ;;  %63 = vadd.xlane.f32.xlu0 %v62_v9  ;;  %69 = vadd.xlane.f32.xlu1 %v68_v10  ;;  %v77_v18 = vsel %vm61_vm0, %v58_v15, 0.0  ;;  %v60_v22 = vmul.f32 %v257_v1, %v48_v20  ;;  %v80_v23 = vsel %vm61_vm0, %v59_v21, 0.0 }
  0x11   :  { %75 = vadd.xlane.f32.xlu2 %v74_v11  ;;  %vm134_vm4 = vcmask 1044484   ;;  %vm136_vm5 = vcmask 1045509   ;;  %vm138_vm6 = vcmask 1046534   ;;  %vm140_vm7 = vcmask 1047559  }
  0x12   :  { %v83_v24 = vsel %vm61_vm0, %v60_v22, 0.0  ;;  %vm143_vm8 = vcmask 64512   ;;  %v348_v11 = vmov 0  }
  0x13   :  { %256 = vset.pattern.permute.xlu2 %v348_v11  ;;  %255 = vset.pattern.permute.xlu1 %v348_v11 }
  0x14   :  { %254 = vset.pattern.permute.xlu0 %v348_v11 }
  0x18   :  { %66 = vadd.xlane.f32.xlu0 %v65_v16  ;;  %72 = vadd.xlane.f32.xlu1 %v71_v17 }
  0x19   :  { %78 = vadd.xlane.f32.xlu2 %v77_v18 }
  0x20   :  { %81 = vadd.xlane.f32.xlu0 %v80_v23  ;;  %84 = vadd.xlane.f32.xlu1 %v83_v24 }
  0x83   :  { %v64_v25 = vpop.xlane.xlu0 %63  ;;  %v70_v26 = vpop.xlane.xlu1 %69 }
  0x84   :  { %v76_v27 = vpop.xlane.xlu2 %75  ;;  %258 = vtanh.f32 %v64_v25 }
  0x85   :  { %260 = vtanh.f32 %v70_v26 }
  0x86   :  { %262 = vtanh.f32 %v76_v27 }
  0x8a   :  { %v259_v28 = vpop.eup %258 }
  0x8b   :  { %v67_v29 = vpop.xlane.xlu0 %66  ;;  %v73_v30 = vpop.xlane.xlu1 %72  ;;  %v94_v32 = vmul.f32 1.442695, %v259_v28 }
  0x8c   :  { %v261_v31 = vpop.eup %260  ;;  %264 = vtanh.f32 %v67_v29  ;;  %v79_v33 = vpop.xlane.xlu2 %78 }
  0x8d   :  { %v98_v34 = vmul.f32 1.442695, %v261_v31  ;;  %266 = vtanh.f32 %v73_v30  ;;  %v263_v35 = vpop.eup %262 }
  0x8e   :  { %268 = vtanh.f32 %v79_v33  ;;  %v102_v41 = vmul.f32 1.442695, %v263_v35 }
  0x8f   :  { %270 = vpow2.f32 %v94_v32 }
  0x90   :  { %272 = vpow2.f32 %v98_v34 }
  0x92   :  { %v265_v36 = vpop.eup %264 }
  0x93   :  { %v96_v37 = vmul.f32 1.442695, %v265_v36  ;;  %v82_v38 = vpop.xlane.xlu0 %81  ;;  %v85_v39 = vpop.xlane.xlu1 %84 }
  0x94   :  { %274 = vtanh.f32 %v82_v38  ;;  %v267_v42 = vpop.eup %266 }
  0x95   :  { %276 = vpow2.f32 %v96_v37  ;;  %v269_v43 = vpop.eup %268  ;;  %v100_v44 = vmul.f32 1.442695, %v267_v42 }
  0x96   :  { %278 = vtanh.f32 %v85_v39  ;;  %v378_v45 = vpop.eup %270  ;;  %v104_v47 = vmul.f32 1.442695, %v269_v43 }
  0x97   :  { %280 = vpow2.f32 %v102_v41  ;;  %v382_v48 = vpop.eup %272  ;;  %v120_v53 = vperm.slane %v378_v45, %v380_v46 }
  0x98   :  { %282 = vpow2.f32 %v100_v44  ;;  %v122_v55 = vperm.slane %v382_v48, %v380_v46 }
  0x99   :  { %284 = vpow2.f32 %v104_v47 }
  0x9a   :  { %v275_v49 = vpop.eup %274 }
  0x9b   :  { %v277_v50 = vpop.eup %276  ;;  %v106_v51 = vmul.f32 1.442695, %v275_v49 }
  0x9c   :  { %v279_v52 = vpop.eup %278  ;;  %v121_v54 = vperm.slane %v277_v50, %v380_v46 }
  0x9d   :  { %286 = vpow2.f32 %v106_v51  ;;  %v108_v56 = vmul.f32 1.442695, %v279_v52  ;;  %v281_v57 = vpop.eup %280 }
  0x9e   :  { %v129_v58 = vsel %vm128_vm1, %v121_v54, %v120_v53  ;;  %v283_v59 = vpop.eup %282  ;;  %v124_v63 = vperm.slane %v281_v57, %v380_v46 }
  0x9f   :  { %288 = vpow2.f32 %v108_v56  ;;  %v131_v60 = vsel %vm130_vm2, %v122_v55, %v129_v58  ;;  %v391_v61 = vpop.eup %284  ;;  %v123_v62 = vperm.slane %v283_v59, %v380_v46 }
  0xa0   :  { %v125_v0 = vperm.slane %v391_v61, %v380_v46 }
  0xa1   :  { %v133_v1 = vsel %vm132_vm3, %v123_v62, %v131_v60 }
  0xa2   :  { %v135_v3 = vsel %vm134_vm4, %v124_v63, %v133_v1 }
  0xa3   :  { %v287_v2 = vpop.eup %286  ;;  %v137_v6 = vsel %vm136_vm5, %v125_v0, %v135_v3 }
  0xa4   :  { %v126_v4 = vperm.slane %v287_v2, %v380_v46 }
  0xa5   :  { %v289_v5 = vpop.eup %288 }
  0xa6   :  { %v127_v7 = vperm.slane %v289_v5, %v380_v46  ;;  %v139_v8 = vsel %vm138_vm6, %v126_v4, %v137_v6 }
  0xa8   :  { %v141_v9 = vsel %vm140_vm7, %v127_v7, %v139_v8 }
  0xa9   :  { %v144_v10 = vsel %vm143_vm8, %v141_v9, 0.0 }
  0xaa   :  { %145 = vadd.xlane.f32.xlu2 %v144_v10 }
 0x11d   :  { %v146_v12 = vpop.xlane.xlu2 %145 }
 0x11e   :  { %290 = vrcp.f32 %v146_v12  ;;  %v158_v16 = vand.u32 2147483648, %v146_v12  ;;  %v156_v18 = vand.u32 2147483647, %v146_v12  ;;  %vm152_vm10 = vweird.f32 %v146_v12 }
 0x120   :  { %v159_v20 = vor.u32 1.1754944e-38, %v158_v16  ;;  %vm157_vm12 = vcmp.eq.f32.partialorder %v156_v18, 8.507059e+37 }
 0x124   :  { %v291_v13 = vpop.eup %290 }
 0x125   :  { %v148_v14 = vmul.f32 %v291_v13, %v146_v12  ;;  %vm153_vm9 = vweird.f32 %v291_v13 }
 0x126   :  { %vm154_vm11 = vmor %vm152_vm10, %vm153_vm9 }
 0x127   :  { %v149_v15 = vsub.f32 1.0, %v148_v14 }
 0x129   :  { %v150_v17 = vmul.f32 %v291_v13, %v149_v15 }
 0x12b   :  { %v151_v19 = vadd.f32 %v291_v13, %v150_v17 }
 0x12d   :  { %v155_v21 = vsel %vm154_vm11, %v291_v13, %v151_v19 }
 0x12e   :  { %v160_v22 = vsel %vm157_vm12, %v159_v20, %v155_v21 }
 0x12f   :  { %v164_v23 = vperm.slane %v160_v22, 2  ;;  %v163_v24 = vperm.slane %v160_v22, 1  ;;  %v162_v25 = vperm.slane %v160_v22, 0  ;;  %v165_v29 = vperm.slane %v160_v22, 3 }
 0x130   :  { %v166_v30 = vperm.slane %v160_v22, 4  ;;  %v169_v34 = vperm.slane %v160_v22, 7  ;;  %v167_v40 = vperm.slane %v160_v22, 5  ;;  %v168_v41 = vperm.slane %v160_v22, 6 }
 0x131   :  { %v180_v26 = vmul.f32 %v382_v48, %v164_v23  ;;  %v179_v27 = vmul.f32 %v277_v50, %v163_v24  ;;  %v178_v28 = vmul.f32 %v378_v45, %v162_v25  ;;  %v181_v35 = vmul.f32 %v283_v59, %v165_v29 }
 0x132   :  { %v182_v36 = vmul.f32 %v281_v57, %v166_v30  ;;  %v185_v37 = vmul.f32 %v289_v5, %v169_v34  ;;  %v183_v43 = vmul.f32 %v391_v61, %v167_v40  ;;  %v184_v44 = vmul.f32 %v287_v2, %v168_v41 }
 0x133   :  { %v188_v31 = vadd.f32 1e-10, %v180_v26  ;;  %v187_v32 = vadd.f32 1e-10, %v179_v27  ;;  %v186_v33 = vadd.f32 1e-10, %v178_v28 }
 0x134   :  { %v189_v38 = vadd.f32 1e-10, %v181_v35  ;;  %v190_v39 = vadd.f32 1e-10, %v182_v36  ;;  %v193_v42 = vadd.f32 1e-10, %v185_v37 }
 0x135   :  { %209 = vperm.xlu2 %256, %v188_v31   ;;  %206 = vperm.xlu1 %255, %v187_v32   ;;  %v191_v45 = vadd.f32 1e-10, %v183_v43  ;;  %v192_v47 = vadd.f32 1e-10, %v184_v44 }
 0x136   :  { %203 = vperm.xlu0 %254, %v186_v33  }
 0x13d   :  { %212 = vperm.xlu2 %256, %v189_v38   ;;  %215 = vperm.xlu1 %255, %v190_v39  }
 0x13e   :  { %224 = vperm.xlu0 %254, %v193_v42  }
 0x145   :  { %218 = vperm.xlu2 %256, %v191_v45   ;;  %221 = vperm.xlu1 %255, %v192_v47  }
 0x18f   :  { %v210_v48 = vpop.permute.xlu2 %209 }
 0x190   :  { %v228_v56 = vperm.slane %v210_v48, %v380_v46 }
 0x197   :  { %v213_v51 = vpop.permute.xlu2 %212 }
 0x198   :  { %v229_v59 = vperm.slane %v213_v51, %v380_v46 }
 0x19f   :  { %v219_v60 = vpop.permute.xlu2 %218 }
 0x1a0   :  { %v231_v0 = vperm.slane %v219_v60, %v380_v46 }
 0x1a7   :  { %v207_v49 = vpop.permute.xlu1 %206 }
 0x1a8   :  { %v204_v50 = vpop.permute.xlu0 %203  ;;  %v227_v52 = vperm.slane %v207_v49, %v380_v46 }
 0x1a9   :  { %v226_v53 = vperm.slane %v204_v50, %v380_v46 }
 0x1ab   :  { %v234_v54 = vsel %vm128_vm1, %v227_v52, %v226_v53 }
 0x1ac   :  { %v235_v57 = vsel %vm130_vm2, %v228_v56, %v234_v54 }
 0x1ad   :  { %v236_v61 = vsel %vm132_vm3, %v229_v59, %v235_v57 }
 0x1af   :  { %v216_v55 = vpop.permute.xlu1 %215 }
 0x1b0   :  { %v230_v58 = vperm.slane %v216_v55, %v380_v46  ;;  %v225_v63 = vpop.permute.xlu0 %224 }
 0x1b1   :  { %v233_v3 = vperm.slane %v225_v63, %v380_v46 }
 0x1b2   :  { %v237_v62 = vsel %vm134_vm4, %v230_v58, %v236_v61 }
 0x1b3   :  { %v238_v4 = vsel %vm136_vm5, %v231_v0, %v237_v62 }
 0x1b7   :  { %v222_v1 = vpop.permute.xlu1 %221 }
 0x1b8   :  { %v232_v2 = vperm.slane %v222_v1, %v380_v46 }
 0x1ba   :  { %v239_v5 = vsel %vm138_vm6, %v232_v2, %v238_v4 }
 0x1bb   :  { %v240_v6 = vsel %vm140_vm7, %v233_v3, %v239_v5 }
 0x1bc   :  { %242 = vst.msk [vmem:[%s429_s2] sm:$0xff] %vm143_vm8, %v240_v6 }
 0x1bd   :  { %247 = vsyncpa [#allocation3], 1 }
 0x1be   :  { %248 = vsyncpa [#allocation5], 1 }

</bundles_post_ra>
